<compile_context>
chip_gen: v7x
topology: tpu7x:2x2x1
jax: 0.10.0
libtpu: 0.0.40
codegen_flags: <defaults>
</compile_context>

<pallas_src>
import math
from functools import partial

import jax
import jax.numpy as jnp
from jax.experimental import pallas as pl
from jax.experimental.pallas import tpu as pltpu


def _build_pe(d_model: int, max_len: int = 1000) -> jnp.ndarray:
    """Deterministic sin/cos positional-encoding buffer, shape (max_len, 1, d_model)."""
    position = jnp.arange(0, max_len, dtype=jnp.float32)[:, None]            # (max_len, 1)
    div_term = jnp.exp(
        jnp.arange(0, d_model, 2, dtype=jnp.float32) * (-math.log(10000.0) / d_model)
    )                                                                         # (d_model//2,)
    angles = position * div_term                                              # (max_len, d_model//2)
    pe = jnp.zeros((max_len, d_model), dtype=jnp.float32)
    pe = pe.at[:, 0::2].set(jnp.sin(angles))
    pe = pe.at[:, 1::2].set(jnp.cos(angles))
    # unsqueeze(0).transpose(0, 1) -> (max_len, 1, d_model)
    return pe[:, None, :]


# ----------------------------------------------------------------------------- kernels


def _add_pe_broadcast_kernel(x_ref, pe_ref, o_ref):
    # x_ref and pe_ref are broadcast-compatible tiles:
    #   3-D path:  x (TR, B, D)  + pe (TR, 1, D)   (broadcast over batch/sublanes)
    #   fold path: x (TR, W)     + pe (TR, W)      (identical flat layout)
    o_ref[...] = (x_ref[...] + pe_ref[...]).astype(o_ref.dtype)


def _add_pe_concat_kernel(x_ref, pe_ref, o_ref, *, batch: int):
    # Fallback: x (TR, B*D), pe (TR, D) -> replicate pe across batch along lanes.
    pe = pe_ref[...]
    if batch > 1:
        pe = jnp.concatenate([pe] * batch, axis=-1)
    o_ref[...] = (x_ref[...] + pe).astype(o_ref.dtype)


# ----------------------------------------------------------------------------- sizing helpers


def _sublane_align(itemsize: int) -> int:
    return {4: 8, 2: 16, 1: 32}.get(int(itemsize), 8)


def _x_tile_budget_bytes() -> int:
    """Generation-aware target bytes of x per grid step."""
    try:
        kind = jax.devices()[0].device_kind.lower()
    except Exception:  # pragma: no cover - defensive
        kind = ""
    if "v5 lite" in kind or "v5e" in kind or "v5litepod" in kind:
        return 3 << 20  # v5e: keep double-buffered total modest
    return 4 << 20      # v6e / v7x: bigger DMAs -> closer to HBM roofline


def _choose_tile_rows(total_rows, row_bytes, align, budget_bytes, round_up_when_full):
    """Rows of x per grid step.

    ~3-4 MiB of x per step amortizes the ~0.35 us/step grid overhead while keeping
    double-buffered x/out/pe under the scoped-VMEM caps.  For large problems we keep
    at least 4 grid steps (megacore sharding on v7x + pipeline warmup) as long as the
    per-step tile stays >= ~1 MiB.
    """
    rows = max(align, (budget_bytes // max(row_bytes, 1)) // align * align)
    if rows >= total_rows:
        if round_up_when_full:
            # Needed when another operand's BlockSpec shares this (second-minor) dim.
            return max(align, -(-total_rows // align) * align)
        return total_rows  # full-extent block is always legal
    quarter = (total_rows // 4) // align * align
    if quarter >= align and quarter * row_bytes >= (1 << 20):
        rows = min(rows, quarter)
    return rows


def _vmem_limit_bytes(*tile_bytes) -> int:
    # 2x (double-buffer) per array + headroom; cap v7x-safe (64 MiB phys / 32 MiB scoped).
    need = 2 * sum(int(b) for b in tile_bytes) + (4 << 20)
    return int(min(max(need, 16 << 20), 28 << 20))


def _compiler_params(x_tile_b, out_tile_b, pe_tile_b):
    return pltpu.CompilerParams(
        dimension_semantics=("parallel",),  # megacore-shardable on v7x; neutral on v5e/v6e
        vmem_limit_bytes=_vmem_limit_bytes(x_tile_b, out_tile_b, pe_tile_b),
    )


# ----------------------------------------------------------------------------- wrapper


def positional_encoding_forward(
    x: jnp.ndarray,
    pe: jnp.ndarray,
    *,
    tile_rows=None,
    donate_x: bool = False,
    out_dtype=None,
) -> jnp.ndarray:
    """x: (S, B, D); pe: (max_len, 1, D) module buffer. Returns x + pe[:S] (broadcast over B)."""
    S, B, D = x.shape
    max_len = pe.shape[0]
    assert pe.shape == (max_len, 1, D), pe.shape
    assert S <= max_len, (S, max_len)

    # torch `x + pe` promotes (e.g. bf16 x + f32 pe -> f32).  Match by default; callers
    # wanting low-precision output pass out_dtype=x.dtype, in which case pe is narrowed
    # in the wrapper (halves pe DMA bytes and drops the per-element convert in-kernel).
    if out_dtype is None:
        out_dtype = jnp.promote_types(x.dtype, pe.dtype)
    out_dtype = jnp.dtype(out_dtype)
    if out_dtype.itemsize < jnp.dtype(pe.dtype).itemsize:
        pe = pe.astype(out_dtype)

    x_item = jnp.dtype(x.dtype).itemsize
    out_item = out_dtype.itemsize
    pe_item = jnp.dtype(pe.dtype).itemsize
    align = _sublane_align(x_item)
    budget = _x_tile_budget_bytes()
    # Alias only when the caller actually donates x (otherwise XLA inserts a full copy).
    can_alias = donate_x and out_dtype == jnp.dtype(x.dtype)

    # ---- Path 1: d_model already lane-dense; broadcast pe over batch in-kernel. ----
    if D % 128 == 0:
        row_bytes = B * D * x_item
        tr = tile_rows if tile_rows is not None else _choose_tile_rows(
            S, row_bytes, align, budget, round_up_when_full=False)
        grid = (pl.cdiv(S, tr),)
        out = pl.pallas_call(
            _add_pe_broadcast_kernel,
            out_shape=jax.ShapeDtypeStruct((S, B, D), out_dtype),
            grid=grid,
            in_specs=[
                pl.BlockSpec((tr, B, D), lambda i: (i, 0, 0)),   # x tile
                pl.BlockSpec((tr, 1, D), lambda i: (i, 0, 0)),   # pe rows (same positions)
            ],
            out_specs=pl.BlockSpec((tr, B, D), lambda i: (i, 0, 0)),
            input_output_aliases=({0: 0} if can_alias else {}),
            compiler_params=_compiler_params(
                tr * B * D * x_item, tr * B * D * out_item, tr * D * pe_item),
        )(x, pe)
        return out

    BD = B * D

    # ---- Path 2: small/odd minor dim -> fold k seq rows into lanes (128-aligned stores). ----
    if BD < 128:
        k = 128 // math.gcd(BD, 128)
        if S % k == 0:
            width = k * BD
            rows = S // k
            x2 = x.reshape(rows, width)
            # Pre-tile pe across batch so x/pe share an identical flat layout (small B only).
            pe2 = jnp.tile(pe.reshape(max_len, D)[:S], (1, B)).reshape(rows, width)
            row_bytes = width * x_item
            tr = tile_rows if tile_rows is not None else _choose_tile_rows(
                rows, row_bytes, align, budget, round_up_when_full=False)
            grid = (pl.cdiv(rows, tr),)
            out2 = pl.pallas_call(
                _add_pe_broadcast_kernel,
                out_shape=jax.ShapeDtypeStruct((rows, width), out_dtype),
                grid=grid,
                in_specs=[
                    pl.BlockSpec((tr, width), lambda i: (i, 0)),
                    pl.BlockSpec((tr, width), lambda i: (i, 0)),
                ],
                out_specs=pl.BlockSpec((tr, width), lambda i: (i, 0)),
                input_output_aliases=({0: 0} if can_alias else {}),
                compiler_params=_compiler_params(
                    tr * width * x_item, tr * width * out_item, tr * width * pe_item),
            )(x2, pe2)
            return out2.reshape(S, B, D)

    # ---- Path 3 (fallback): lane-dense (S, B*D) slab, compact pe, in-kernel replication. ----
    x2 = x.reshape(S, BD)
    pe2 = pe.reshape(max_len, D)
    row_bytes = BD * x_item
    tr = tile_rows if tile_rows is not None else _choose_tile_rows(
        S, row_bytes, align, budget, round_up_when_full=True)
    grid = (pl.cdiv(S, tr),)
    out2 = pl.pallas_call(
        partial(_add_pe_concat_kernel, batch=B),
        out_shape=jax.ShapeDtypeStruct((S, BD), out_dtype),
        grid=grid,
        in_specs=[
            pl.BlockSpec((tr, BD), lambda i: (i, 0)),   # x tile
            pl.BlockSpec((tr, D), lambda i: (i, 0)),    # pe rows (same positions)
        ],
        out_specs=pl.BlockSpec((tr, BD), lambda i: (i, 0)),
        input_output_aliases=({0: 0} if can_alias else {}),
        compiler_params=_compiler_params(
            tr * BD * x_item, tr * BD * out_item, tr * D * pe_item),
    )(x2, pe2)
    return out2.reshape(S, B, D)


if __name__ == "__main__":
    max_len = 1000

    # Case 1: toy shape from the module (seq=8, batch=2, d_model=32) -> folded-lane path.
    S, B, D = 8, 2, 32
    pe32 = _build_pe(D, max_len=max_len)
    x = jax.random.normal(jax.random.PRNGKey(0), (S, B, D), dtype=jnp.float32)
    out = jax.block_until_ready(positional_encoding_forward(x, pe32))
    ref = x + pe32[:S]
    assert out.shape == (S, B, D) and out.dtype == ref.dtype
    assert jnp.allclose(out, ref, atol=1e-6), "mismatch (case 1: fold path)"

    # Case 2: multi-step pipelined folded path with a partial last block.
    S2 = 40
    x2 = jax.random.normal(jax.random.PRNGKey(1), (S2, B, D), dtype=jnp.float32)
    out2 = jax.block_until_ready(positional_encoding_forward(x2, pe32, tile_rows=8))
    ref2 = x2 + pe32[:S2]
    assert jnp.allclose(out2, ref2, atol=1e-6), "mismatch (case 2: tiled fold path)"

    # Case 3: odd sequence length (fold not applicable) -> fallback concat path.
    S3 = 9
    x3 = jax.random.normal(jax.random.PRNGKey(2), (S3, B, D), dtype=jnp.float32)
    out3 = jax.block_until_ready(positional_encoding_forward(x3, pe32))
    ref3 = x3 + pe32[:S3]
    assert jnp.allclose(out3, ref3, atol=1e-6), "mismatch (case 3: fallback path)"

    # Case 4: 128-aligned d_model -> 3-D broadcast path (pe broadcasts over batch).
    S4, B4, D4 = 16, 2, 128
    pe128 = _build_pe(D4, max_len=max_len)
    x4 = jax.random.normal(jax.random.PRNGKey(3), (S4, B4, D4), dtype=jnp.float32)
    out4 = jax.block_until_ready(positional_encoding_forward(x4, pe128, tile_rows=8))
    ref4 = x4 + pe128[:S4]
    assert jnp.allclose(out4, ref4, atol=1e-6), "mismatch (case 4: 3-D broadcast path)"

    # Case 5: bf16 activations + f32 pe -> output promoted to f32, matching torch.
    x5 = jax.random.normal(jax.random.PRNGKey(4), (S, B, D), dtype=jnp.float32).astype(jnp.bfloat16)
    out5 = jax.block_until_ready(positional_encoding_forward(x5, pe32))
    ref5 = x5.astype(jnp.float32) + pe32[:S]
    assert out5.dtype == jnp.float32
    assert jnp.allclose(out5, ref5, atol=1e-6), "mismatch (case 5: bf16 promotion)"

    print("KERNEL_OK")
</pallas_src>

<mosaic_0001>
module attributes {stable_mosaic.version = 11 : i64} {
  func.func @_add_pe_broadcast_kernel(%arg0: i32, %arg1: memref<4x128xf32, #tpu.memory_space<vmem>>, %arg2: memref<4x128xf32, #tpu.memory_space<vmem>>, %arg3: memref<4x128xf32, #tpu.memory_space<vmem>>) attributes {dimension_semantics = [#tpu.dimension_semantics<parallel>], iteration_bounds = array<i64: 1>, scalar_prefetch = 0 : i64, scratch_operands = 0 : i64, tpu.core_type = #tpu.core_type<tc>, window_params = [{transform_indices = @transform_0, window_bounds = array<i64: 4, 128>}, {transform_indices = @transform_1, window_bounds = array<i64: 4, 128>}, {transform_indices = @transform_2, window_bounds = array<i64: 4, 128>}]} {
    %c0 = arith.constant 0 : index
    %c0_0 = arith.constant 0 : index
    %0 = vector.load %arg1[%c0, %c0_0] : memref<4x128xf32, #tpu.memory_space<vmem>>, vector<4x128xf32>
    %c0_1 = arith.constant 0 : index
    %c0_2 = arith.constant 0 : index
    %1 = vector.load %arg2[%c0_1, %c0_2] : memref<4x128xf32, #tpu.memory_space<vmem>>, vector<4x128xf32>
    %2 = arith.addf %0, %1 : vector<4x128xf32>
    %c0_3 = arith.constant 0 : index
    %c0_4 = arith.constant 0 : index
    %3 = vector.load %arg3[%c0_3, %c0_4] : memref<4x128xf32, #tpu.memory_space<vmem>>, vector<4x128xf32>
    tpu.vector_store %arg3[%c0_3, %c0_4], %2 {strides = array<i32>} : memref<4x128xf32, #tpu.memory_space<vmem>>, vector<4x128xf32>,
    return
  }
  func.func @transform_0(%arg0: i32) -> (i32, i32) {
    %c0_i32 = arith.constant 0 : i32
    %c0_i32_0 = arith.constant 0 : i32
    return %arg0, %c0_i32 : i32, i32
  }
  func.func @transform_1(%arg0: i32) -> (i32, i32) {
    %c0_i32 = arith.constant 0 : i32
    %c0_i32_0 = arith.constant 0 : i32
    return %arg0, %c0_i32 : i32, i32
  }
  func.func @transform_2(%arg0: i32) -> (i32, i32) {
    %c0_i32 = arith.constant 0 : i32
    %c0_i32_0 = arith.constant 0 : i32
    return %arg0, %c0_i32 : i32, i32
  }
}

</mosaic_0001>

<bundles_post_ra>
// kernel: tpu_custom_call.1
= control target key start
LH: loop header
LB: loop body
LE: loop exit
PB: predicated region body
PF: predicated region fallthrough
CT: control target
= control target key end

     0   :  { %7 = vsyncpa [#allocation3], 0  ;;  %s185_s0 = inlined_call_operand.hbm [shape: f32[4,128], index: 0, kind: input, shape index: {}]   ;;  %s186_s1 = inlined_call_operand.hbm [shape: f32[4,128], index: 1, kind: input, shape index: {}]   ;;  %s187_s2 = inlined_call_operand.hbm [shape: f32[4,128], index: 2, kind: output, shape index: {}]  }
   0x1   :  { %8 = vsyncpa [#allocation6], 0 }
   0x2   :  { %9 = vsyncpa [#allocation4], 0  ;;  %s131_s9 = smov [#allocation2]   ;;  %s132_s11 = smov [#allocation5]  }
   0x3   :  { %s16_s10 = sshll.u32 %s131_s9, 4  ;;  %s26_s12 = sshll.u32 %s132_s11, 4  ;;  %s17_s10 = int_to_ptr.vmem [resolvable:$true] %s16_s10  ;;  %s27_s12 = int_to_ptr.vmem [resolvable:$true] %s26_s12 }
   0x4   :  { %s59_s15 = scalar_lea.hbm %s185_s0, 64 }
   0x5   :  { %p60_p0 = scmp.ne.s32.totalorder %s185_s0, %s59_s15  ;;  %p63_p1 = scmp.lt.u32.totalorder %s59_s15, %s185_s0 }
   0x7   :  { %p65_p2 = pnand %p63_p1, %p60_p0 }
   0x9   :  { %68 = shalt.err (!%p65_p2)
}
   0xa   :  { %s69_s20 = scalar_lea.vmem %s17_s10, 64  ;;  %p74_p4 = scmp.lt.s32.totalorder %s17_s10, %s17_s10 }
   0xb   :  { %p70_p3 = scmp.ne.s32.totalorder %s17_s10, %s69_s20  ;;  %p75_p5 = scmp.lt.s32.totalorder %s69_s20, %s69_s20 }
   0xd   :  { %p76_p6 = por %p75_p5, %p74_p4 }
   0xf   :  { %p77_p7 = pnand %p76_p6, %p70_p3 }
  0x11   :  { %80 = shalt.err (!%p77_p7)
}
  0x12   :  { %19 = dma.hbm_to_vmem [thread:$0]  %s185_s0, 64, %s17_s10, [#allocation3]  }
  0x13   :  { %s81_s25 = scalar_lea.hbm %s186_s1, 64 }
  0x14   :  { %p82_p8 = scmp.ne.s32.totalorder %s186_s1, %s81_s25  ;;  %p85_p9 = scmp.lt.u32.totalorder %s81_s25, %s186_s1 }
  0x16   :  { %p87_p10 = pnand %p85_p9, %p82_p8 }
  0x18   :  { %90 = shalt.err (!%p87_p10)
}
  0x19   :  { %s91_s30 = scalar_lea.vmem %s27_s12, 64  ;;  %p96_p12 = scmp.lt.s32.totalorder %s27_s12, %s27_s12 }
  0x1a   :  { %p92_p11 = scmp.ne.s32.totalorder %s27_s12, %s91_s30  ;;  %p97_p13 = scmp.lt.s32.totalorder %s91_s30, %s91_s30 }
  0x1c   :  { %p98_p0 = por %p97_p13, %p96_p12 }
  0x1e   :  { %p99_p1 = pnand %p98_p0, %p92_p11 }
  0x20   :  { %102 = shalt.err (!%p99_p1)
}
  0x21   :  { %29 = dma.hbm_to_vmem [thread:$0]  %s186_s1, 64, %s27_s12, [#allocation6]  }
  0x22   :  { %125 = dma.done.wait [#allocation3], 64  }
  0x23   :  { %126 = vsyncadd [#allocation3], 4294967232 }
  0x24   :  { %127 = dma.done.wait [#allocation6], 64  }
  0x25   :  { %128 = vsyncadd [#allocation6], 4294967232  ;;  %s133_s4 = smov [#allocation7]   ;;  %v36_v0 = vld [vmem:[#allocation2] sm:$0xf] }
  0x26   :  { %s46_s5 = sshll.u32 %s133_s4, 4  ;;  %v37_v1 = vld [vmem:[#allocation5] sm:$0xf]  ;;  %s47_s5 = int_to_ptr.vmem [resolvable:$true] %s46_s5 }
  0x27   :  { %v38_v2 = vadd.f32 %v37_v1, %v36_v0  ;;  %s103_s6 = scalar_lea.vmem %s47_s5, 64  ;;  %p108_p3 = scmp.lt.s32.totalorder %s47_s5, %s47_s5 }
  0x28   :  { %p104_p2 = scmp.ne.s32.totalorder %s47_s5, %s103_s6  ;;  %p109_p4 = scmp.lt.s32.totalorder %s103_s6, %s103_s6 }
  0x29   :  { %39 = vst [vmem:[#allocation7] sm:$0xf] %v38_v2 }
  0x2a   :  { %p110_p5 = por %p109_p4, %p108_p3 }
  0x2c   :  { %p111_p6 = pnand %p110_p5, %p104_p2 }
  0x2e   :  { %114 = shalt.err (!%p111_p6)
}
  0x2f   :  { %s115_s8 = scalar_lea.hbm %s187_s2, 64 }
  0x30   :  { %p116_p7 = scmp.ne.s32.totalorder %s187_s2, %s115_s8  ;;  %p119_p8 = scmp.lt.u32.totalorder %s115_s8, %s187_s2 }
  0x32   :  { %p121_p9 = pnand %p119_p8, %p116_p7 }
  0x34   :  { %124 = shalt.err (!%p121_p9)
}
  0x35   :  { %49 = dma.vmem_to_hbm [thread:$0]  %s47_s5, 64, %s187_s2, [#allocation4]  }
  0x36   :  { %129 = dma.done.wait [#allocation4], 64  }
  0x37   :  { %130 = vsyncadd [#allocation4], 4294967232 }
  0x38   :  { %53 = vsyncpa [#allocation3], 1 }
  0x39   :  { %54 = vsyncpa [#allocation6], 1 }
  0x3a   :  { %55 = vsyncpa [#allocation4], 1 }

</bundles_post_ra>
